<compile_context>
chip_gen: v5e
topology: v5e:2x2
jax: 0.10.0
libtpu: 0.0.40
codegen_flags: <defaults>
</compile_context>

<pallas_src>
import jax
import jax.numpy as jnp
from jax import lax
from jax.experimental import pallas as pl
from jax.experimental.pallas import tpu as pltpu


def discriminator_kernel(xT_ref, w1_ref, b1_ref, w2_ref, b2_ref, w3_ref, b3_ref, o_ref):
    # xT_ref: [D2, N]   (inputs transposed: batch on lanes)
    # w1_ref: [D3, D2], b1_ref: [D3, 1]
    # w2_ref: [D1, D3], b2_ref: [D1, 1]
    # w3_ref: [1, D1],  b3_ref: [1, 1]  (SMEM scalar)
    # o_ref:  [1, N]
    xT = xT_ref[...]

    # Layer 1: relu(W1 @ x^T + b1)  -> [D3, N]
    h1 = jnp.dot(w1_ref[...], xT, preferred_element_type=jnp.float32) + b1_ref[...]
    h1 = jnp.maximum(h1, 0.0)

    # Layer 2: relu(W2 @ h1 + b2)   -> [D1, N]
    h2 = jnp.dot(w2_ref[...], h1, preferred_element_type=jnp.float32) + b2_ref[...]
    h2 = jnp.maximum(h2, 0.0)

    # Output layer: W3 @ h2 + b3    -> [1, N]  (batch stays on lanes; lane-dense store)
    out = jnp.dot(w3_ref[...], h2, preferred_element_type=jnp.float32) + b3_ref[0, 0]
    o_ref[...] = out.astype(o_ref.dtype)


def discriminator_forward(inputs, params):
    """inputs: [N, hidden_dim2].  Returns [N, 1], matching the PyTorch module."""
    N, D2 = inputs.shape
    w1, b1 = params["w1"], params["b1"]      # [D3, D2], [D3]
    w2, b2 = params["w2"], params["b2"]      # [D1, D3], [D1]
    w3, b3 = params["w3"], params["b3"]      # [1, D1],  [1]
    D3 = w1.shape[0]
    D1 = w2.shape[0]
    assert w1.shape == (D3, D2) and w2.shape == (D1, D3) and w3.shape == (1, D1)

    # Glue (cheap XLA ops outside the kernel): batch-on-lanes layout + column biases.
    xT = jnp.transpose(inputs)               # [D2, N]
    b1c = b1.reshape(D3, 1)
    b2c = b2.reshape(D1, 1)
    b3s = b3.reshape(1, 1)

    out_1n = pl.pallas_call(
        discriminator_kernel,
        out_shape=jax.ShapeDtypeStruct((1, N), jnp.float32),
        grid=(1,),
        in_specs=[
            pl.BlockSpec((D2, N), lambda i: (0, 0)),             # x^T
            pl.BlockSpec((D3, D2), lambda i: (0, 0)),            # W1
            pl.BlockSpec((D3, 1), lambda i: (0, 0)),             # b1 (column)
            pl.BlockSpec((D1, D3), lambda i: (0, 0)),            # W2
            pl.BlockSpec((D1, 1), lambda i: (0, 0)),             # b2 (column)
            pl.BlockSpec((1, D1), lambda i: (0, 0)),             # W3 (row)
            pl.BlockSpec(memory_space=pltpu.MemorySpace.SMEM),   # b3 scalar
        ],
        out_specs=pl.BlockSpec((1, N), lambda i: (0, 0)),
        compiler_params=pltpu.CompilerParams(
            dimension_semantics=("arbitrary",)),
    )(xT, w1, b1c, w2, b2c, w3, b3s)

    return jnp.transpose(out_1n)             # [1, N] -> [N, 1]


def reference_forward(inputs, params):
    """Pure-JAX reference mirroring the PyTorch forward (high-precision dots)."""
    hi = lax.Precision.HIGHEST
    h1 = jax.nn.relu(jnp.dot(inputs, params["w1"].T, precision=hi) + params["b1"])
    h2 = jax.nn.relu(jnp.dot(h1, params["w2"].T, precision=hi) + params["b2"])
    return jnp.dot(h2, params["w3"].T, precision=hi) + params["b3"]


if __name__ == "__main__":
    # Shapes implied by the module: inputs [N, hidden_dim2];
    # Linear chain hidden_dim2 -> hidden_dim3 -> hidden_dim1 -> 1.
    N, hidden_dim1, hidden_dim2, hidden_dim3 = 8, 32, 16, 64

    key = jax.random.PRNGKey(0)
    ks = jax.random.split(key, 5)

    # Faithful to the PyTorch __init__: weights ~ N(0, 0.001), biases = 0.
    params = {
        "w1": 0.001 * jax.random.normal(ks[0], (hidden_dim3, hidden_dim2), jnp.float32),
        "b1": jnp.zeros((hidden_dim3,), jnp.float32),
        "w2": 0.001 * jax.random.normal(ks[1], (hidden_dim1, hidden_dim3), jnp.float32),
        "b2": jnp.zeros((hidden_dim1,), jnp.float32),
        "w3": 0.001 * jax.random.normal(ks[2], (1, hidden_dim1), jnp.float32),
        "b3": jnp.zeros((1,), jnp.float32),
    }
    inputs = jax.random.normal(ks[3], (N, hidden_dim2), jnp.float32)

    out = jax.block_until_ready(discriminator_forward(inputs, params))
    assert out.shape == (N, 1)
    ref = reference_forward(inputs, params)
    assert jnp.allclose(out, ref, atol=1e-5, rtol=1e-5), "mismatch vs reference (spec init)"

    # Second check with O(0.1)-scale weights/biases so the comparison is non-trivial.
    kb = jax.random.split(ks[4], 6)
    params_big = {
        "w1": 0.1 * jax.random.normal(kb[0], (hidden_dim3, hidden_dim2), jnp.float32),
        "b1": 0.1 * jax.random.normal(kb[1], (hidden_dim3,), jnp.float32),
        "w2": 0.1 * jax.random.normal(kb[2], (hidden_dim1, hidden_dim3), jnp.float32),
        "b2": 0.1 * jax.random.normal(kb[3], (hidden_dim1,), jnp.float32),
        "w3": 0.1 * jax.random.normal(kb[4], (1, hidden_dim1), jnp.float32),
        "b3": 0.1 * jax.random.normal(kb[5], (1,), jnp.float32),
    }
    out2 = jax.block_until_ready(discriminator_forward(inputs, params_big))
    ref2 = reference_forward(inputs, params_big)
    assert jnp.allclose(out2, ref2, atol=1e-4, rtol=1e-4), "mismatch vs reference (scaled init)"

    print("KERNEL_OK")
</pallas_src>

<mosaic_0001>
module attributes {stable_mosaic.version = 11 : i64} {
  func.func @discriminator_kernel(%arg0: i32, %arg1: memref<16x8xf32, #tpu.memory_space<vmem>>, %arg2: memref<64x16xf32, #tpu.memory_space<vmem>>, %arg3: memref<64x1xf32, #tpu.memory_space<vmem>>, %arg4: memref<32x64xf32, #tpu.memory_space<vmem>>, %arg5: memref<32x1xf32, #tpu.memory_space<vmem>>, %arg6: memref<1x32xf32, #tpu.memory_space<vmem>>, %arg7: memref<1x1xf32, #tpu.memory_space<smem>>, %arg8: memref<1x8xf32, #tpu.memory_space<vmem>>) attributes {dimension_semantics = [#tpu.dimension_semantics<arbitrary>], iteration_bounds = array<i64: 1>, scalar_prefetch = 0 : i64, scratch_operands = 0 : i64, tpu.core_type = #tpu.core_type<tc>, window_params = [{pipeline_mode = #tpu.pipeline_mode<synchronous>, transform_indices = @transform_0, window_bounds = array<i64: 16, 8>}, {pipeline_mode = #tpu.pipeline_mode<synchronous>, transform_indices = @transform_1, window_bounds = array<i64: 64, 16>}, {pipeline_mode = #tpu.pipeline_mode<synchronous>, transform_indices = @transform_2, window_bounds = array<i64: 64, 1>}, {pipeline_mode = #tpu.pipeline_mode<synchronous>, transform_indices = @transform_3, window_bounds = array<i64: 32, 64>}, {pipeline_mode = #tpu.pipeline_mode<synchronous>, transform_indices = @transform_4, window_bounds = array<i64: 32, 1>}, {pipeline_mode = #tpu.pipeline_mode<synchronous>, transform_indices = @transform_5, window_bounds = array<i64: 1, 32>}, {transform_indices = @transform_6, window_bounds = array<i64: 1, 1>}, {pipeline_mode = #tpu.pipeline_mode<synchronous>, transform_indices = @transform_7, window_bounds = array<i64: 1, 8>}]} {
    %c0 = arith.constant 0 : index
    %c0_0 = arith.constant 0 : index
    %0 = vector.load %arg1[%c0, %c0_0] : memref<16x8xf32, #tpu.memory_space<vmem>>, vector<16x8xf32>
    %c0_1 = arith.constant 0 : index
    %c0_2 = arith.constant 0 : index
    %1 = vector.load %arg2[%c0_1, %c0_2] : memref<64x16xf32, #tpu.memory_space<vmem>>, vector<64x16xf32>
    %cst = arith.constant dense<0.000000e+00> : vector<64x8xf32>
    %2 = tpu.matmul %1, %0, %cst {dimension_numbers = #tpu.dot_dimension_numbers<[1], [0], [0], [1], [0, 0, 1, 1], [], []>} : vector<64x16xf32>, vector<16x8xf32>, vector<64x8xf32> -> vector<64x8xf32>
    %c0_3 = arith.constant 0 : index
    %c0_4 = arith.constant 0 : index
    %3 = vector.load %arg3[%c0_3, %c0_4] : memref<64x1xf32, #tpu.memory_space<vmem>>, vector<64x1xf32>
    %4 = vector.broadcast %3 : vector<64x1xf32> to vector<64x8xf32>
    %5 = arith.addf %2, %4 : vector<64x8xf32>
    %cst_5 = arith.constant 0.000000e+00 : f32
    %6 = vector.broadcast %cst_5 : f32 to vector<64x8xf32>
    %7 = arith.maximumf %5, %6 : vector<64x8xf32>
    %c0_6 = arith.constant 0 : index
    %c0_7 = arith.constant 0 : index
    %8 = vector.load %arg4[%c0_6, %c0_7] : memref<32x64xf32, #tpu.memory_space<vmem>>, vector<32x64xf32>
    %cst_8 = arith.constant dense<0.000000e+00> : vector<32x8xf32>
    %9 = tpu.matmul %8, %7, %cst_8 {dimension_numbers = #tpu.dot_dimension_numbers<[1], [0], [0], [1], [0, 0, 1, 1], [], []>} : vector<32x64xf32>, vector<64x8xf32>, vector<32x8xf32> -> vector<32x8xf32>
    %c0_9 = arith.constant 0 : index
    %c0_10 = arith.constant 0 : index
    %10 = vector.load %arg5[%c0_9, %c0_10] : memref<32x1xf32, #tpu.memory_space<vmem>>, vector<32x1xf32>
    %11 = vector.broadcast %10 : vector<32x1xf32> to vector<32x8xf32>
    %12 = arith.addf %9, %11 : vector<32x8xf32>
    %cst_11 = arith.constant 0.000000e+00 : f32
    %13 = vector.broadcast %cst_11 : f32 to vector<32x8xf32>
    %14 = arith.maximumf %12, %13 : vector<32x8xf32>
    %c0_12 = arith.constant 0 : index
    %c0_13 = arith.constant 0 : index
    %15 = vector.load %arg6[%c0_12, %c0_13] : memref<1x32xf32, #tpu.memory_space<vmem>>, vector<1x32xf32>
    %cst_14 = arith.constant dense<0.000000e+00> : vector<1x8xf32>
    %16 = tpu.matmul %15, %14, %cst_14 {dimension_numbers = #tpu.dot_dimension_numbers<[1], [0], [0], [1], [0, 0, 1, 1], [], []>} : vector<1x32xf32>, vector<32x8xf32>, vector<1x8xf32> -> vector<1x8xf32>
    %c0_15 = arith.constant 0 : index
    %c0_16 = arith.constant 0 : index
    %17 = memref.load %arg7[%c0_15, %c0_16] : memref<1x1xf32, #tpu.memory_space<smem>>
    %18 = vector.broadcast %17 : f32 to vector<1x8xf32>
    %19 = arith.addf %16, %18 : vector<1x8xf32>
    %c0_17 = arith.constant 0 : index
    %c0_18 = arith.constant 0 : index
    %20 = vector.load %arg8[%c0_17, %c0_18] : memref<1x8xf32, #tpu.memory_space<vmem>>, vector<1x8xf32>
    tpu.vector_store %arg8[%c0_17, %c0_18], %19 {strides = array<i32>} : memref<1x8xf32, #tpu.memory_space<vmem>>, vector<1x8xf32>,
    return
  }
  func.func @transform_0(%arg0: i32) -> (i32, i32) {
    %c0_i32 = arith.constant 0 : i32
    %c0_i32_0 = arith.constant 0 : i32
    %c0_i32_1 = arith.constant 0 : i32
    return %c0_i32, %c0_i32_0 : i32, i32
  }
  func.func @transform_1(%arg0: i32) -> (i32, i32) {
    %c0_i32 = arith.constant 0 : i32
    %c0_i32_0 = arith.constant 0 : i32
    %c0_i32_1 = arith.constant 0 : i32
    return %c0_i32, %c0_i32_0 : i32, i32
  }
  func.func @transform_2(%arg0: i32) -> (i32, i32) {
    %c0_i32 = arith.constant 0 : i32
    %c0_i32_0 = arith.constant 0 : i32
    %c0_i32_1 = arith.constant 0 : i32
    return %c0_i32, %c0_i32_0 : i32, i32
  }
  func.func @transform_3(%arg0: i32) -> (i32, i32) {
    %c0_i32 = arith.constant 0 : i32
    %c0_i32_0 = arith.constant 0 : i32
    %c0_i32_1 = arith.constant 0 : i32
    return %c0_i32, %c0_i32_0 : i32, i32
  }
  func.func @transform_4(%arg0: i32) -> (i32, i32) {
    %c0_i32 = arith.constant 0 : i32
    %c0_i32_0 = arith.constant 0 : i32
    %c0_i32_1 = arith.constant 0 : i32
    return %c0_i32, %c0_i32_0 : i32, i32
  }
  func.func @transform_5(%arg0: i32) -> (i32, i32) {
    %c0_i32 = arith.constant 0 : i32
    %c0_i32_0 = arith.constant 0 : i32
    %c0_i32_1 = arith.constant 0 : i32
    return %c0_i32, %c0_i32_0 : i32, i32
  }
  func.func @transform_6(%arg0: i32) -> (i32, i32) {
    %c0_i32 = arith.constant 0 : i32
    %c0_i32_0 = arith.constant 0 : i32
    %c0_i32_1 = arith.constant 0 : i32
    return %c0_i32, %c0_i32_0 : i32, i32
  }
  func.func @transform_7(%arg0: i32) -> (i32, i32) {
    %c0_i32 = arith.constant 0 : i32
    %c0_i32_0 = arith.constant 0 : i32
    %c0_i32_1 = arith.constant 0 : i32
    return %c0_i32, %c0_i32_0 : i32, i32
  }
}

</mosaic_0001>

<bundles_post_ra>
// kernel: tpu_custom_call.1
= control target key start
LH: loop header
LB: loop body
LE: loop exit
PB: predicated region body
PF: predicated region fallthrough
CT: control target
= control target key end

     0   :  { %vm86_vm0 = vcmask 130048   ;;  %v333_v4 = vmov 0   ;;  %s470_s0 = inlined_call_operand.vmem [shape: f32[16,8], index: 0, kind: input, shape index: {}]   ;;  %s471_s1 = inlined_call_operand.vmem [shape: f32[64,16], index: 1, kind: input, shape index: {}]   ;;  %s472_s2 = inlined_call_operand.vmem [shape: f32[64,1], index: 2, kind: input, shape index: {}]   ;;  %s473_s3 = inlined_call_operand.vmem [shape: f32[32,64], index: 3, kind: input, shape index: {}]   ;;  %s474_s4 = inlined_call_operand.vmem [shape: f32[32,1], index: 4, kind: input, shape index: {}]   ;;  %s475_s5 = inlined_call_operand.vmem [shape: f32[1,32], index: 5, kind: input, shape index: {}]   ;;  %s476_s6 = inlined_call_operand.<no memory space> [shape: f32[1,1], index: 6, kind: input, shape index: {}]   ;;  %s477_s7 = inlined_call_operand.hbm [shape: f32[1,8], index: 7, kind: output, shape index: {}]  }
   0x1   :  { %v29_v0 = vld [vmem:[%s470_s0 + $0x8] sm:$0xff]  ;;  %v28_v1 = vld [vmem:[%s470_s0] sm:$0xff]  ;;  %305 = vset.pattern.permute.xlu1 %v333_v4  ;;  %304 = vset.pattern.permute.xlu0 %v333_v4  ;;  %v45_v6 = vld [vmem:[%s472_s2 + $0x38] sm:$0xff] }
   0x2   :  { %292 = vmatpush.msra.mxu3 %v29_v0  ;;  %v34_v2 = vld [vmem:[%s471_s1 + $0x20] sm:$0xff]  ;;  %125 = vmatpush.msra.mxu0 %v29_v0  ;;  %v43_v5 = vld [vmem:[%s472_s2 + $0x28] sm:$0xff]  ;;  %v41_v7 = vld [vmem:[%s472_s2 + $0x18] sm:$0xff] }
   0x3   :  { %v30_v3 = vld [vmem:[%s471_s1] sm:$0xff]  ;;  %73 = vperm.xlu1 %305, %v43_v5   ;;  %83 = vperm.xlu0 %304, %v45_v6  }
   0x4   :  { %293 = vmatpush.msra.mxu3 %v28_v1  ;;  %126 = vmatpush.msra.mxu0 %v28_v1 }
   0x5   :  { %283 = vmatmul.msk.f32.vlgmr.msra.gmra.mxu3 %vm86_vm0, %v34_v2  ;;  %279 = vmatmul.msk.f32.vlgmr.msra.gmra.mxu0 %vm86_vm0, %v30_v3 }
   0x6   :  { %306 = vset.pattern.permute.xlu2 %v333_v4 }
   0x7   :  { %63 = vperm.xlu2 %306, %v41_v7  }
   0x8   :  { %13 = vsyncpa [#allocation4], 0  ;;  %v35_v8 = vld [vmem:[%s471_s1 + $0x28] sm:$0xff]  ;;  %v42_v10 = vld [vmem:[%s472_s2 + $0x20] sm:$0xff]  ;;  %vm188_vm1 = vcmask 523264   ;;  %vm237_vm2 = vcmask 261120  }
   0x9   :  { %v31_v9 = vld [vmem:[%s471_s1 + $0x8] sm:$0xff]  ;;  %v44_v11 = vld [vmem:[%s472_s2 + $0x30] sm:$0xff]  ;;  %v38_v15 = vld [vmem:[%s472_s2] sm:$0xff]  ;;  %s334_s28 = smov [#allocation3]   ;;  %s270_s9 = sshll.u32 %s477_s7, 4  ;;  %vm261_vm3 = vcmask 57344   ;;  %s271_s9 = int_to_ptr.hbm [resolvable:$true] %s270_s9 }
   0xa   :  { %v40_v12 = vld [vmem:[%s472_s2 + $0x10] sm:$0xff]  ;;  %v39_v16 = vld [vmem:[%s472_s2 + $0x8] sm:$0xff]  ;;  %v167_v17 = vld [vmem:[%s474_s4 + $0x18] sm:$0xff]  ;;  %s268_s29 = sshll.u32 %s334_s28, 4  ;;  %s269_s29 = int_to_ptr.vmem [resolvable:$true] %s268_s29 }
   0xb   :  { %68 = vperm.xlu1 %305, %v42_v10   ;;  %78 = vperm.xlu0 %304, %v44_v11   ;;  %v36_v13 = vld [vmem:[%s471_s1 + $0x30] sm:$0xff]  ;;  %v37_v18 = vld [vmem:[%s471_s1 + $0x38] sm:$0xff]  ;;  %v165_v21 = vld [vmem:[%s474_s4 + $0x8] sm:$0xff] }
   0xc   :  { %v32_v14 = vld [vmem:[%s471_s1 + $0x10] sm:$0xff]  ;;  %v33_v19 = vld [vmem:[%s471_s1 + $0x18] sm:$0xff]  ;;  %v164_v22 = vld [vmem:[%s474_s4] sm:$0xff] }
   0xd   :  { %284 = vmatmul.msk.f32.gmra.mxu3 %vm86_vm0, %v35_v8  ;;  %280 = vmatmul.msk.f32.gmra.mxu0 %vm86_vm0, %v31_v9  ;;  %v166_v20 = vld [vmem:[%s474_s4 + $0x10] sm:$0xff]  ;;  %v160_v55 = vld [vmem:[%s473_s3] sm:$0xff]  ;;  %v163_v56 = vld [vmem:[%s473_s3 + $0x18] sm:$0xff] }
   0xe   :  { %v161_v57 = vld [vmem:[%s473_s3 + $0x8] sm:$0xff]  ;;  %v162_v58 = vld [vmem:[%s473_s3 + $0x10] sm:$0xff]  ;;  %v234_v11 = vld [vmem:[%s475_s5] sm:$0x1] }
   0xf   :  { %58 = vperm.xlu2 %306, %v40_v12   ;;  %v236_v12 = vstv %s476_s6 }
  0x13   :  { %48 = vperm.xlu1 %305, %v38_v15   ;;  %53 = vperm.xlu0 %304, %v39_v16  }
  0x15   :  { %285 = vmatmul.msk.f32.gmra.mxu3 %vm86_vm0, %v36_v13  ;;  %281 = vmatmul.msk.f32.gmra.mxu0 %vm86_vm0, %v32_v14 }
  0x17   :  { %185 = vperm.xlu2 %306, %v167_v17  }
  0x1b   :  { %180 = vperm.xlu0 %304, %v166_v20   ;;  %175 = vperm.xlu1 %305, %v165_v21  }
  0x1d   :  { %286 = vmatmul.msk.f32.gmra.mxu3 %vm86_vm0, %v37_v18  ;;  %282 = vmatmul.msk.f32.gmra.mxu0 %vm86_vm0, %v33_v19 }
  0x1f   :  { %170 = vperm.xlu2 %306, %v164_v22  }
  0x61   :  { %v64_v31 = vpop.permute.xlu2 %63 }
  0x69   :  { %v59_v44 = vpop.permute.xlu2 %58 }
  0x71   :  { %v186_v60 = vpop.permute.xlu2 %185 }
  0x75   :  { %v74_v27 = vpop.permute.xlu1 %73  ;;  %v84_v28 = vpop.permute.xlu0 %83 }
  0x79   :  { %v171_v6 = vpop.permute.xlu2 %170 }
  0x7d   :  { %v69_v32 = vpop.permute.xlu1 %68  ;;  %v79_v33 = vpop.permute.xlu0 %78 }
  0x82   :  { %v128_v23 = vpop.f32.mrf.mxu0 }
  0x85   :  { %v49_v47 = vpop.permute.xlu1 %48  ;;  %v54_v48 = vpop.permute.xlu0 %53 }
  0x86   :  { %v129_v51 = vadd.f32 %v128_v23, %v49_v47 }
  0x88   :  { %v140_v24 = vpop.f32.mrf.mxu3  ;;  %v152_v54 = vmax.f32 %v129_v51, 0.0 }
  0x89   :  { %v141_v40 = vadd.f32 %v140_v24, %v69_v32 }
  0x8a   :  { %v131_v26 = vpop.f32.mrf.mxu0 }
  0x8b   :  { %v156_v45 = vmax.f32 %v141_v40, 0.0  ;;  %v132_v49 = vadd.f32 %v131_v26, %v54_v48 }
  0x8d   :  { %v153_v53 = vmax.f32 %v132_v49, 0.0  ;;  %v176_v1 = vpop.permute.xlu1 %175  ;;  %v181_v2 = vpop.permute.xlu0 %180 }
  0x90   :  { %v143_v25 = vpop.f32.mrf.mxu3 }
  0x91   :  { %v144_v37 = vadd.f32 %v143_v25, %v74_v27 }
  0x92   :  { %v134_v30 = vpop.f32.mrf.mxu0 }
  0x93   :  { %v157_v42 = vmax.f32 %v144_v37, 0.0  ;;  %v135_v46 = vadd.f32 %v134_v30, %v59_v44 }
  0x95   :  { %v154_v52 = vmax.f32 %v135_v46, 0.0 }
  0x98   :  { %v146_v29 = vpop.f32.mrf.mxu3 }
  0x99   :  { %v147_v35 = vadd.f32 %v146_v29, %v79_v33 }
  0x9a   :  { %v137_v39 = vpop.f32.mrf.mxu0 }
  0x9b   :  { %v158_v41 = vmax.f32 %v147_v35, 0.0  ;;  %v138_v43 = vadd.f32 %v137_v39, %v64_v31 }
  0x9d   :  { %v155_v50 = vmax.f32 %v138_v43, 0.0 }
  0xa0   :  { %v149_v34 = vpop.f32.mrf.mxu3 }
  0xa1   :  { %v150_v36 = vadd.f32 %v149_v34, %v84_v28 }
  0xa3   :  { %v159_v38 = vmax.f32 %v150_v36, 0.0 }
  0xa5   :  { %209 = vmatpush.msra.mxu1 %v159_v38  ;;  %294 = vmatpush.msra.mxu2 %v159_v38 }
  0xa7   :  { %210 = vmatpush.msra.mxu1 %v158_v41  ;;  %295 = vmatpush.msra.mxu2 %v158_v41 }
  0xa9   :  { %211 = vmatpush.msra.mxu1 %v157_v42  ;;  %296 = vmatpush.msra.mxu2 %v157_v42 }
  0xab   :  { %212 = vmatpush.msra.mxu1 %v156_v45  ;;  %297 = vmatpush.msra.mxu2 %v156_v45 }
  0xad   :  { %213 = vmatpush.msra.mxu1 %v155_v50  ;;  %298 = vmatpush.msra.mxu2 %v155_v50 }
  0xaf   :  { %214 = vmatpush.msra.mxu1 %v154_v52  ;;  %299 = vmatpush.msra.mxu2 %v154_v52 }
  0xb1   :  { %215 = vmatpush.msra.mxu1 %v153_v53  ;;  %300 = vmatpush.msra.mxu2 %v153_v53 }
  0xb3   :  { %216 = vmatpush.msra.mxu1 %v152_v54  ;;  %301 = vmatpush.msra.mxu2 %v152_v54 }
  0xb4   :  { %287 = vmatmul.msk.f32.vlgmr.msra.gmra.mxu1 %vm188_vm1, %v160_v55  ;;  %290 = vmatmul.msk.f32.vlgmr.msra.gmra.mxu2 %vm188_vm1, %v163_v56 }
  0xbc   :  { %288 = vmatmul.msk.f32.gmra.mxu1 %vm188_vm1, %v161_v57 }
  0xc4   :  { %289 = vmatmul.msk.f32.gmra.mxu1 %vm188_vm1, %v162_v58 }
 0x131   :  { %v218_v59 = vpop.f32.mrf.mxu1 }
 0x132   :  { %v219_v7 = vadd.f32 %v218_v59, %v171_v6 }
 0x134   :  { %v230_v10 = vmax.f32 %v219_v7, 0.0 }
 0x137   :  { %v227_v61 = vpop.f32.mrf.mxu2 }
 0x138   :  { %v228_v62 = vadd.f32 %v227_v61, %v186_v60 }
 0x139   :  { %v221_v63 = vpop.f32.mrf.mxu1 }
 0x13a   :  { %v233_v0 = vmax.f32 %v228_v62, 0.0  ;;  %v222_v4 = vadd.f32 %v221_v63, %v176_v1 }
 0x13c   :  { %253 = vmatpush.msrb.mxu2 %v233_v0  ;;  %v231_v9 = vmax.f32 %v222_v4, 0.0 }
 0x141   :  { %v224_v3 = vpop.f32.mrf.mxu1 }
 0x142   :  { %v225_v5 = vadd.f32 %v224_v3, %v181_v2 }
 0x144   :  { %v232_v8 = vmax.f32 %v225_v5, 0.0 }
 0x146   :  { %254 = vmatpush.msrb.mxu2 %v232_v8 }
 0x148   :  { %255 = vmatpush.msrb.mxu2 %v231_v9 }
 0x14a   :  { %256 = vmatpush.msrb.mxu2 %v230_v10 }
 0x14b   :  { %291 = vmatmul.msk.f32.vlgmr.msrb.gmra.mxu2 %vm237_vm2, %v234_v11 }
 0x1ce   :  { %v258_v13 = vpop.f32.mrf.mxu2 }
 0x1cf   :  { %v259_v14 = vadd.f32 %v258_v13, %v236_v12 }
 0x1d1   :  { %262 = vst.msk [vmem:[#allocation3] sm:$0x1] %vm261_vm3, %v259_v14 }
 0x1d2   :  { %273 = dma.vmem_to_hbm [thread:$0]  %s269_s29, 16, %s271_s9, [#allocation4]  }
 0x1d3   :  { %331 = dma.done.wait [#allocation4], 16  }
 0x1d4   :  { %332 = vsyncadd [#allocation4], 4294967280 }
 0x1d5   :  { %278 = vsyncpa [#allocation4], 1 }

</bundles_post_ra>
